<compile_context>
chip_gen: v7x
topology: tpu7x:2x2x1
jax: 0.10.0
libtpu: 0.0.40
codegen_flags: <defaults>
</compile_context>

<pallas_src>
import functools

import jax
import jax.numpy as jnp
from jax.experimental import pallas as pl
from jax.experimental.pallas import tpu as pltpu


# ----------------------------------------------------------------------------
# Fused decode kernel: grid=(T,) over decode steps, weights resident in VMEM
# ----------------------------------------------------------------------------
def decoder_fused_kernel(
    emb_ref,      # [1, Bp, E]   f32   per-step embedded tokens (time-indexed block)
    hid0_ref,     # [Bp, Dh]     f32   initial hidden (constant index -> fetched once)
    enc_ref,      # [S*Bp, 2H]   f32   encoder outputs, S-major flat (resident)
    wa_h_ref,     # [Dh, Ap]     bf16  attention weight (decoder-hidden rows), A padded
    wa_e_ref,     # [2H, Ap]     bf16  attention weight (encoder-output rows), A padded
    ba_ref,       # [1, Ap]      f32
    wih_e_ref,    # [E,  3Dh]    bf16  GRU input->hidden, emb rows
    wih_w_ref,    # [2H, 3Dh]    bf16  GRU input->hidden, weighted rows
    whh_ref,      # [Dh, 3Dh]    bf16  GRU hidden->hidden
    bih_ref,      # [1, 3Dh]     f32
    bhh_ref,      # [1, 3Dh]     f32
    wo_h_ref,     # [Dh, Vp]     bf16  output Linear, h_new rows (V padded to Vp)
    wo_w_ref,     # [2H, Vp]     bf16  output Linear, weighted rows
    wo_e_ref,     # [E,  Vp]     bf16  output Linear, emb rows
    bo_ref,       # [1, Vp]      f32
    logits_ref,   # [1, Bp, Vp]  f32 out (lane-dense, time-indexed block)
    newhid_ref,   # [Bp, Dh]     f32 out (constant index; aliased with hid0 HBM buffer)
    eproj_sc,     # [S*Bp, Ap]   f32 scratch: enc @ Wa_e (loop-invariant)
    hid_sc,       # [Bp, Dh]     f32 scratch: hidden-state carry across steps
):
    t = pl.program_id(0)

    @pl.when(t == 0)
    def _init():
        hid_sc[...] = hid0_ref[...]
        # Encoder half of the attention energy does not depend on the hidden
        # state -> compute it once and reuse every decode step.
        eproj_sc[...] = jnp.dot(enc_ref[...].astype(jnp.bfloat16), wa_e_ref[...],
                                preferred_element_type=jnp.float32)

    emb = emb_ref[0]        # [Bp, E]  f32
    hid = hid_sc[...]       # [Bp, Dh] f32
    enc = enc_ref[...]      # [S*Bp, 2H] f32

    Bp, Dh = hid.shape
    SBp, H2 = enc.shape
    S = SBp // Bp
    Ap = wa_h_ref.shape[1]

    emb_bf = emb.astype(jnp.bfloat16)
    hid_bf = hid.astype(jnp.bfloat16)

    # ---------------- additive attention ----------------
    # energy[s, b, :] = tanh(enc[s,b] @ Wa_e + hid[b] @ Wa_h + ba)
    h_proj = (jnp.dot(hid_bf, wa_h_ref[...], preferred_element_type=jnp.float32)
              + ba_ref[...])                                                       # [Bp, Ap]
    # reshape is a free leading-dim split (Bp = 8 sublanes, Ap lane-dense)
    energy = jnp.tanh(eproj_sc[...].reshape(S, Bp, Ap) + h_proj[None, :, :])       # [S, Bp, Ap]

    # A-reduction on the XLU lane-reduce (padded A columns are exact zeros).
    scores = jnp.sum(energy, axis=-1, keepdims=True)                               # [S, Bp, 1]

    # softmax over S: reductions over the leading (tile) axis — pure VPU ops,
    # batch stays on sublanes.  (At production S, transpose to [Bp, S] first.)
    m = jnp.max(scores, axis=0, keepdims=True)
    p = jnp.exp(scores - m)
    l = jnp.sum(p, axis=0, keepdims=True)
    attn = p / l                                                                   # [S, Bp, 1]

    # weighted encoder representation: sum_s attn[s,b] * enc[s,b,:]
    weighted = jnp.sum(attn * enc.reshape(S, Bp, H2), axis=0)                      # [Bp, 2H] f32
    wgt_bf = weighted.astype(jnp.bfloat16)

    # ---------------- single GRU step (gates ordered [r, z, n]) ----------------
    gi = (jnp.dot(emb_bf, wih_e_ref[...], preferred_element_type=jnp.float32)
          + jnp.dot(wgt_bf, wih_w_ref[...], preferred_element_type=jnp.float32)
          + bih_ref[...])                                                          # [Bp, 3Dh]
    gh = jnp.dot(hid_bf, whh_ref[...], preferred_element_type=jnp.float32) + bhh_ref[...]

    i_r, i_z, i_n = gi[:, :Dh], gi[:, Dh:2 * Dh], gi[:, 2 * Dh:]
    h_r, h_z, h_n = gh[:, :Dh], gh[:, Dh:2 * Dh], gh[:, 2 * Dh:]

    r = jax.nn.sigmoid(i_r + h_r)
    z = jax.nn.sigmoid(i_z + h_z)
    n = jnp.tanh(i_n + r * h_n)
    h_new = (1.0 - z) * n + z * hid                                                # [Bp, Dh] f32

    # ---------------- output projection (split matmuls, no concat) ----------------
    logits = (jnp.dot(h_new.astype(jnp.bfloat16), wo_h_ref[...],
                      preferred_element_type=jnp.float32)
              + jnp.dot(wgt_bf, wo_w_ref[...], preferred_element_type=jnp.float32)
              + jnp.dot(emb_bf, wo_e_ref[...], preferred_element_type=jnp.float32)
              + bo_ref[...])                                                       # [Bp, Vp]

    logits_ref[0] = logits
    hid_sc[...] = h_new
    newhid_ref[...] = h_new


# ----------------------------------------------------------------------------
# One-time parameter preparation (hoisted out of the decode loop)
# ----------------------------------------------------------------------------
def _round_up(n, m):
    return ((n + m - 1) // m) * m


def _pad_last(x, target):
    pad = target - x.shape[-1]
    if pad == 0:
        return x
    return jnp.pad(x, [(0, 0)] * (x.ndim - 1) + [(0, pad)])


def prepare_decoder_params(params, *, mxu_dtype=jnp.bfloat16):
    """Transpose / split / zero-pad / bf16-cast all weights once, before decoding.

    MXU-side weights are stored in `mxu_dtype` (bf16: native MXU rate, half the
    DMA bytes / VMEM).  Biases stay f32 (added after the f32-accumulating dot).
    """
    V, _ = params["wo"].shape
    A = params["wa"].shape[0]
    Dh = params["w_hh"].shape[1]
    E = params["embedding"].shape[1]
    H2 = params["wa"].shape[1] - Dh          # = 2 * enc_hid_dim

    Ap = _round_up(A, 128)
    Vp = _round_up(V, 128)

    wa = params["wa"]                        # [A, Dh + 2H]
    w_ih = params["w_ih"]                    # [3Dh, E + 2H]    (input order: emb, weighted)
    wo = params["wo"]                        # [V, Dh + 2H + E] (feat order: h_new, weighted, emb)

    def mx(x):
        return x.astype(mxu_dtype)

    return {
        "embedding": params["embedding"],                 # f32; gather stays in the wrapper
        # attention (padded A columns are zero -> tanh(0)=0 -> scores unchanged)
        "wa_h": mx(_pad_last(wa[:, :Dh].T, Ap)),          # [Dh, Ap]
        "wa_e": mx(_pad_last(wa[:, Dh:].T, Ap)),          # [2H, Ap]
        "ba": _pad_last(params["ba"][None, :], Ap),       # [1, Ap] f32
        # GRU (input->hidden split by input chunk to avoid in-kernel concat)
        "wih_e": mx(w_ih[:, :E].T),                       # [E,  3Dh]
        "wih_w": mx(w_ih[:, E:].T),                       # [2H, 3Dh]
        "whh": mx(params["w_hh"].T),                      # [Dh, 3Dh]
        "bih": params["b_ih"][None, :],                   # [1, 3Dh] f32
        "bhh": params["b_hh"][None, :],                   # [1, 3Dh] f32
        # output Linear (split by feature chunk, V padded to Vp for lane-dense stores)
        "wo_h": mx(_pad_last(wo[:, :Dh].T, Vp)),          # [Dh, Vp]
        "wo_w": mx(_pad_last(wo[:, Dh:Dh + H2].T, Vp)),   # [2H, Vp]
        "wo_e": mx(_pad_last(wo[:, Dh + H2:].T, Vp)),     # [E,  Vp]
        "bo": _pad_last(params["bo"][None, :], Vp),       # [1, Vp] f32
    }


# ----------------------------------------------------------------------------
# Fused T-step decode (weights resident across steps) + single-step wrapper
# ----------------------------------------------------------------------------
@functools.partial(jax.jit, static_argnames=("out_dim",))
def decoder_decode_fused(prep, token_ids, decoder_hidden, encoder_outputs, *, out_dim):
    """Run T decoder steps in one pallas_call.

    token_ids:        [T, B] int32 (e.g. teacher-forced targets)
    decoder_hidden:   [B, Dh]
    encoder_outputs:  [S, B, 2H]
    returns           (logits [T, B, V], new_hidden [B, Dh])
    """
    T, B = token_ids.shape
    S, _, H2 = encoder_outputs.shape
    Dh = decoder_hidden.shape[1]
    E = prep["embedding"].shape[1]
    Ap = prep["wa_h"].shape[1]
    Vp = prep["wo_h"].shape[1]
    G = 3 * Dh

    Bp = max(8, _round_up(B, 8))
    pad_b = Bp - B

    # ---- loop-invariant glue: done ONCE for all T steps (was per-token) ----
    emb_seq = prep["embedding"][token_ids]                           # [T, B, E] gather once
    emb_seq_p = jnp.pad(emb_seq, ((0, 0), (0, pad_b), (0, 0)))       # [T, Bp, E]
    hid_p = jnp.pad(decoder_hidden, ((0, pad_b), (0, 0)))            # [Bp, Dh]
    enc_p = jnp.pad(encoder_outputs, ((0, 0), (0, pad_b), (0, 0)))   # [S, Bp, 2H]
    enc_flat = enc_p.reshape(S * Bp, H2)                             # free view, no transpose
    SBp = S * Bp

    flops = (2 * SBp * H2 * Ap                                        # one-time enc projection
             + T * 2 * (Bp * Dh * Ap
                        + Bp * E * G + Bp * H2 * G + Bp * Dh * G      # GRU matmuls
                        + Bp * Dh * Vp + Bp * H2 * Vp + Bp * E * Vp)) # output projection
    transcendentals = T * (SBp * Ap + SBp + 3 * Bp * Dh)
    bytes_accessed = (2 * (Dh * Ap + H2 * Ap + E * G + H2 * G + Dh * G
                           + Dh * Vp + H2 * Vp + E * Vp)              # bf16 weights, once
                      + 4 * (Ap + 2 * G + Vp)                         # f32 biases, once
                      + 4 * (SBp * H2 + Bp * Dh)                      # enc + hid0, once
                      + T * 4 * (Bp * E + Bp * Vp)                    # per-step streams
                      + 4 * Bp * Dh)                                  # final hidden

    const2 = lambda t: (0, 0)
    grid_spec = pltpu.PrefetchScalarGridSpec(
        num_scalar_prefetch=0,
        grid=(T,),
        in_specs=[
            pl.BlockSpec((1, Bp, E), lambda t: (t, 0, 0)),   # embedded tokens, streamed
            pl.BlockSpec((Bp, Dh), const2),                  # initial hidden, fetched once
            pl.BlockSpec((SBp, H2), const2),                 # encoder outputs, resident
            pl.BlockSpec((Dh, Ap), const2),                  # --- weights: all resident ---
            pl.BlockSpec((H2, Ap), const2),
            pl.BlockSpec((1, Ap), const2),
            pl.BlockSpec((E, G), const2),
            pl.BlockSpec((H2, G), const2),
            pl.BlockSpec((Dh, G), const2),
            pl.BlockSpec((1, G), const2),
            pl.BlockSpec((1, G), const2),
            pl.BlockSpec((Dh, Vp), const2),
            pl.BlockSpec((H2, Vp), const2),
            pl.BlockSpec((E, Vp), const2),
            pl.BlockSpec((1, Vp), const2),
        ],
        out_specs=(
            pl.BlockSpec((1, Bp, Vp), lambda t: (t, 0, 0)),  # per-step logits, streamed
            pl.BlockSpec((Bp, Dh), const2),                  # final hidden, written at end
        ),
        scratch_shapes=[
            pltpu.VMEM((SBp, Ap), jnp.float32),              # enc @ Wa_e (loop-invariant)
            pltpu.VMEM((Bp, Dh), jnp.float32),               # hidden-state carry
        ],
    )

    logits_all, newhid = pl.pallas_call(
        decoder_fused_kernel,
        out_shape=(
            jax.ShapeDtypeStruct((T, Bp, Vp), jnp.float32),
            jax.ShapeDtypeStruct((Bp, Dh), jnp.float32),
        ),
        grid_spec=grid_spec,
        # Safe: hid0 is fetched once at the grid prologue; the aliased HBM
        # buffer is only written when the newhid block flushes at grid end.
        input_output_aliases={1: 1},
        compiler_params=pltpu.CompilerParams(
            dimension_semantics=("arbitrary",),              # sequential carry over time
            vmem_limit_bytes=32 * 1024 * 1024,               # room for resident weights (v5e default is 16 MiB)
        ),
        cost_estimate=pl.CostEstimate(
            flops=flops, transcendentals=transcendentals, bytes_accessed=bytes_accessed),
    )(
        emb_seq_p, hid_p, enc_flat,
        prep["wa_h"], prep["wa_e"], prep["ba"],
        prep["wih_e"], prep["wih_w"], prep["whh"], prep["bih"], prep["bhh"],
        prep["wo_h"], prep["wo_w"], prep["wo_e"], prep["bo"],
    )

    # slice off batch / vocab padding (padded vocab columns are exact zeros)
    return logits_all[:, :B, :out_dim], newhid[:B]


def decoder_step(prep, input_ids, decoder_hidden, encoder_outputs, *, out_dim):
    """Single decoder step == the PyTorch Decoder.forward (eval mode); T=1 case."""
    logits, new_hidden = decoder_decode_fused(
        prep, input_ids[None, :], decoder_hidden, encoder_outputs, out_dim=out_dim)
    return logits[0], new_hidden


# ----------------------------------------------------------------------------
# Pure-JAX reference mirroring the PyTorch forward (eval mode, f32)
# ----------------------------------------------------------------------------
def decoder_forward_ref(params, input_ids, decoder_hidden, encoder_outputs):
    embedded = params["embedding"][input_ids]                     # [B, E]
    enc = jnp.transpose(encoder_outputs, (1, 0, 2))               # [B, S, 2H]
    B, S, _ = enc.shape
    Dh = decoder_hidden.shape[1]

    rep_hid = jnp.broadcast_to(decoder_hidden[:, None, :], (B, S, Dh))
    cat = jnp.concatenate([rep_hid, enc], axis=2)
    energy = jnp.tanh(cat @ params["wa"].T + params["ba"])
    scores = jnp.sum(energy, axis=2)
    attn = jax.nn.softmax(scores, axis=1)
    weighted = jnp.einsum("bs,bsh->bh", attn, enc)

    x = jnp.concatenate([embedded, weighted], axis=1)
    gi = x @ params["w_ih"].T + params["b_ih"]
    gh = decoder_hidden @ params["w_hh"].T + params["b_hh"]
    i_r, i_z, i_n = gi[:, :Dh], gi[:, Dh:2 * Dh], gi[:, 2 * Dh:]
    h_r, h_z, h_n = gh[:, :Dh], gh[:, Dh:2 * Dh], gh[:, 2 * Dh:]
    r = jax.nn.sigmoid(i_r + h_r)
    z = jax.nn.sigmoid(i_z + h_z)
    n = jnp.tanh(i_n + r * h_n)
    h_new = (1.0 - z) * n + z * decoder_hidden

    feat = jnp.concatenate([h_new, weighted, embedded], axis=1)
    logits = feat @ params["wo"].T + params["bo"]
    return logits, h_new


def make_params(key, output_dim, emb_dim, enc_hid_dim, dec_hid_dim, attn_dim):
    attn_in = enc_hid_dim * 2 + dec_hid_dim
    ks = jax.random.split(key, 9)
    s = 0.1
    return {
        "embedding": s * jax.random.normal(ks[0], (output_dim, emb_dim), jnp.float32),
        # attention Linear(attn_in -> attn_dim)
        "wa": s * jax.random.normal(ks[1], (attn_dim, attn_in), jnp.float32),
        "ba": s * jax.random.normal(ks[2], (attn_dim,), jnp.float32),
        # GRU(enc_hid*2 + emb -> dec_hid), single layer, gates ordered [r, z, n]
        "w_ih": s * jax.random.normal(ks[3], (3 * dec_hid_dim, enc_hid_dim * 2 + emb_dim), jnp.float32),
        "w_hh": s * jax.random.normal(ks[4], (3 * dec_hid_dim, dec_hid_dim), jnp.float32),
        "b_ih": s * jax.random.normal(ks[5], (3 * dec_hid_dim,), jnp.float32),
        "b_hh": s * jax.random.normal(ks[6], (3 * dec_hid_dim,), jnp.float32),
        # out Linear(attn_in + emb -> output_dim)
        "wo": s * jax.random.normal(ks[7], (output_dim, attn_in + emb_dim), jnp.float32),
        "bo": s * jax.random.normal(ks[8], (output_dim,), jnp.float32),
    }


if __name__ == "__main__":
    # small, forward-consistent shapes
    OUTPUT_DIM = 50     # target vocab size
    EMB_DIM = 32
    ENC_HID = 16        # encoder is bidirectional -> encoder_outputs feature dim = 32
    DEC_HID = 32
    ATTN_DIM = 8
    SRC_LEN = 8
    BATCH = 4
    T_STEPS = 6         # fused decode length (teacher-forced token sequence)

    key = jax.random.PRNGKey(0)
    kp, k1, k2, k3, k4 = jax.random.split(key, 5)
    params = make_params(kp, OUTPUT_DIM, EMB_DIM, ENC_HID, DEC_HID, ATTN_DIM)

    input_ids = jax.random.randint(k1, (BATCH,), 0, OUTPUT_DIM, dtype=jnp.int32)
    decoder_hidden = jax.random.normal(k2, (BATCH, DEC_HID), jnp.float32)
    encoder_outputs = jax.random.normal(k3, (SRC_LEN, BATCH, 2 * ENC_HID), jnp.float32)
    token_seq = jax.random.randint(k4, (T_STEPS, BATCH), 0, OUTPUT_DIM, dtype=jnp.int32)

    # f32 references (inputs never donated/aliased)
    ref_logits, ref_hidden = decoder_forward_ref(params, input_ids, decoder_hidden, encoder_outputs)
    ref_hid = decoder_hidden
    ref_seq_logits = []
    for t in range(T_STEPS):
        lg, ref_hid = decoder_forward_ref(params, token_seq[t], ref_hid, encoder_outputs)
        ref_seq_logits.append(lg)
    ref_seq_logits = jnp.stack(ref_seq_logits)

    # one-time weight preparation (transpose/split/pad + bf16 cast)
    prep = prepare_decoder_params(params)

    # --- single module-forward step (T=1 case of the fused kernel) ---
    logits, new_hidden = decoder_step(prep, input_ids, decoder_hidden, encoder_outputs,
                                      out_dim=OUTPUT_DIM)
    jax.block_until_ready((logits, new_hidden))
    assert logits.shape == (BATCH, OUTPUT_DIM)
    assert new_hidden.shape == (BATCH, DEC_HID)
    # bf16 MXU operands -> relaxed tolerance (f32 accumulation, f32 VPU/EUP math)
    assert jnp.allclose(logits, ref_logits, rtol=2e-2, atol=2e-2)
    assert jnp.allclose(new_hidden, ref_hidden, rtol=2e-2, atol=2e-2)

    # --- fused T-step decode: one pallas_call, weights resident across steps ---
    seq_logits, seq_hidden = decoder_decode_fused(prep, token_seq, decoder_hidden,
                                                  encoder_outputs, out_dim=OUTPUT_DIM)
    jax.block_until_ready((seq_logits, seq_hidden))
    assert seq_logits.shape == (T_STEPS, BATCH, OUTPUT_DIM)
    assert seq_hidden.shape == (BATCH, DEC_HID)
    assert jnp.allclose(seq_logits, ref_seq_logits, rtol=2e-2, atol=2e-2)
    assert jnp.allclose(seq_hidden, ref_hid, rtol=2e-2, atol=2e-2)

    print("KERNEL_OK")
</pallas_src>

<mosaic_0001>
module attributes {stable_mosaic.version = 11 : i64} {
  func.func @decoder_fused_kernel(%arg0: i32, %arg1: memref<1x8x32xf32, #tpu.memory_space<vmem>>, %arg2: memref<8x32xf32, #tpu.memory_space<vmem>>, %arg3: memref<64x32xf32, #tpu.memory_space<vmem>>, %arg4: memref<32x128xbf16, #tpu.memory_space<vmem>>, %arg5: memref<32x128xbf16, #tpu.memory_space<vmem>>, %arg6: memref<1x128xf32, #tpu.memory_space<vmem>>, %arg7: memref<32x96xbf16, #tpu.memory_space<vmem>>, %arg8: memref<32x96xbf16, #tpu.memory_space<vmem>>, %arg9: memref<32x96xbf16, #tpu.memory_space<vmem>>, %arg10: memref<1x96xf32, #tpu.memory_space<vmem>>, %arg11: memref<1x96xf32, #tpu.memory_space<vmem>>, %arg12: memref<32x128xbf16, #tpu.memory_space<vmem>>, %arg13: memref<32x128xbf16, #tpu.memory_space<vmem>>, %arg14: memref<32x128xbf16, #tpu.memory_space<vmem>>, %arg15: memref<1x128xf32, #tpu.memory_space<vmem>>, %arg16: memref<1x8x128xf32, #tpu.memory_space<vmem>>, %arg17: memref<8x32xf32, #tpu.memory_space<vmem>>, %arg18: memref<64x128xf32, #tpu.memory_space<vmem>>, %arg19: memref<8x32xf32, #tpu.memory_space<vmem>>) attributes {dimension_semantics = [#tpu.dimension_semantics<arbitrary>], iteration_bounds = array<i64: 1>, scalar_prefetch = 0 : i64, scratch_operands = 2 : i64, tpu.core_type = #tpu.core_type<tc>, window_params = [{transform_indices = @transform_0, window_bounds = array<i64: 1, 8, 32>}, {pipeline_mode = #tpu.pipeline_mode<synchronous>, transform_indices = @transform_1, window_bounds = array<i64: 8, 32>}, {pipeline_mode = #tpu.pipeline_mode<synchronous>, transform_indices = @transform_2, window_bounds = array<i64: 64, 32>}, {pipeline_mode = #tpu.pipeline_mode<synchronous>, transform_indices = @transform_3, window_bounds = array<i64: 32, 128>}, {pipeline_mode = #tpu.pipeline_mode<synchronous>, transform_indices = @transform_4, window_bounds = array<i64: 32, 128>}, {pipeline_mode = #tpu.pipeline_mode<synchronous>, transform_indices = @transform_5, window_bounds = array<i64: 1, 128>}, {pipeline_mode = #tpu.pipeline_mode<synchronous>, transform_indices = @transform_6, window_bounds = array<i64: 32, 96>}, {pipeline_mode = #tpu.pipeline_mode<synchronous>, transform_indices = @transform_7, window_bounds = array<i64: 32, 96>}, {pipeline_mode = #tpu.pipeline_mode<synchronous>, transform_indices = @transform_8, window_bounds = array<i64: 32, 96>}, {pipeline_mode = #tpu.pipeline_mode<synchronous>, transform_indices = @transform_9, window_bounds = array<i64: 1, 96>}, {pipeline_mode = #tpu.pipeline_mode<synchronous>, transform_indices = @transform_10, window_bounds = array<i64: 1, 96>}, {pipeline_mode = #tpu.pipeline_mode<synchronous>, transform_indices = @transform_11, window_bounds = array<i64: 32, 128>}, {pipeline_mode = #tpu.pipeline_mode<synchronous>, transform_indices = @transform_12, window_bounds = array<i64: 32, 128>}, {pipeline_mode = #tpu.pipeline_mode<synchronous>, transform_indices = @transform_13, window_bounds = array<i64: 32, 128>}, {pipeline_mode = #tpu.pipeline_mode<synchronous>, transform_indices = @transform_14, window_bounds = array<i64: 1, 128>}, {transform_indices = @transform_15, window_bounds = array<i64: 1, 8, 128>}, {pipeline_mode = #tpu.pipeline_mode<synchronous>, transform_indices = @transform_16, window_bounds = array<i64: 8, 32>}]} {
    %c0_i32 = arith.constant 0 : i32
    %0 = arith.cmpi eq, %arg0, %c0_i32 : i32
    %1 = arith.extui %0 : i1 to i32
    %c0_i32_0 = arith.constant 0 : i32
    %2 = arith.cmpi ne, %1, %c0_i32_0 : i32
    scf.if %2 {
      %c0_51 = arith.constant 0 : index
      %c0_52 = arith.constant 0 : index
      %92 = vector.load %arg2[%c0_51, %c0_52] : memref<8x32xf32, #tpu.memory_space<vmem>>, vector<8x32xf32>
      %c0_53 = arith.constant 0 : index
      %c0_54 = arith.constant 0 : index
      %93 = vector.load %arg19[%c0_53, %c0_54] : memref<8x32xf32, #tpu.memory_space<vmem>>, vector<8x32xf32>
      tpu.vector_store %arg19[%c0_53, %c0_54], %92 {strides = array<i32>} : memref<8x32xf32, #tpu.memory_space<vmem>>, vector<8x32xf32>,
      %c0_55 = arith.constant 0 : index
      %c0_56 = arith.constant 0 : index
      %94 = vector.load %arg3[%c0_55, %c0_56] : memref<64x32xf32, #tpu.memory_space<vmem>>, vector<64x32xf32>
      %95 = arith.truncf %94 : vector<64x32xf32> to vector<64x32xbf16>
      %c0_57 = arith.constant 0 : index
      %c0_58 = arith.constant 0 : index
      %96 = vector.load %arg5[%c0_57, %c0_58] : memref<32x128xbf16, #tpu.memory_space<vmem>>, vector<32x128xbf16>
      %cst_59 = arith.constant dense<0.000000e+00> : vector<64x128xf32>
      %97 = tpu.matmul %95, %96, %cst_59 {dimension_numbers = #tpu.dot_dimension_numbers<[1], [0], [0], [1], [0, 0, 1, 1], [], []>} : vector<64x32xbf16>, vector<32x128xbf16>, vector<64x128xf32> -> vector<64x128xf32>
      %c0_60 = arith.constant 0 : index
      %c0_61 = arith.constant 0 : index
      %98 = vector.load %arg18[%c0_60, %c0_61] : memref<64x128xf32, #tpu.memory_space<vmem>>, vector<64x128xf32>
      tpu.vector_store %arg18[%c0_60, %c0_61], %97 {strides = array<i32>} : memref<64x128xf32, #tpu.memory_space<vmem>>, vector<64x128xf32>,
    } else {
    }
    %c0 = arith.constant 0 : index
    %c0_1 = arith.constant 0 : index
    %c0_2 = arith.constant 0 : index
    %3 = vector.load %arg1[%c0, %c0_1, %c0_2] : memref<1x8x32xf32, #tpu.memory_space<vmem>>, vector<1x8x32xf32>
    %4 = vector.shape_cast %3 : vector<1x8x32xf32> to vector<8x32xf32>
    %c0_3 = arith.constant 0 : index
    %c0_4 = arith.constant 0 : index
    %5 = vector.load %arg19[%c0_3, %c0_4] : memref<8x32xf32, #tpu.memory_space<vmem>>, vector<8x32xf32>
    %c0_5 = arith.constant 0 : index
    %c0_6 = arith.constant 0 : index
    %6 = vector.load %arg3[%c0_5, %c0_6] : memref<64x32xf32, #tpu.memory_space<vmem>>, vector<64x32xf32>
    %7 = arith.truncf %4 : vector<8x32xf32> to vector<8x32xbf16>
    %8 = arith.truncf %5 : vector<8x32xf32> to vector<8x32xbf16>
    %c0_7 = arith.constant 0 : index
    %c0_8 = arith.constant 0 : index
    %9 = vector.load %arg4[%c0_7, %c0_8] : memref<32x128xbf16, #tpu.memory_space<vmem>>, vector<32x128xbf16>
    %cst = arith.constant dense<0.000000e+00> : vector<8x128xf32>
    %10 = tpu.matmul %8, %9, %cst {dimension_numbers = #tpu.dot_dimension_numbers<[1], [0], [0], [1], [0, 0, 1, 1], [], []>} : vector<8x32xbf16>, vector<32x128xbf16>, vector<8x128xf32> -> vector<8x128xf32>
    %c0_9 = arith.constant 0 : index
    %c0_10 = arith.constant 0 : index
    %11 = vector.load %arg6[%c0_9, %c0_10] : memref<1x128xf32, #tpu.memory_space<vmem>>, vector<1x128xf32>
    %12 = vector.broadcast %11 : vector<1x128xf32> to vector<8x128xf32>
    %13 = arith.addf %10, %12 : vector<8x128xf32>
    %c0_11 = arith.constant 0 : index
    %c0_12 = arith.constant 0 : index
    %14 = vector.load %arg18[%c0_11, %c0_12] : memref<64x128xf32, #tpu.memory_space<vmem>>, vector<64x128xf32>
    %15 = vector.shape_cast %14 : vector<64x128xf32> to vector<8x8x128xf32>
    %16 = vector.shape_cast %13 : vector<8x128xf32> to vector<1x8x128xf32>
    %17 = vector.broadcast %16 : vector<1x8x128xf32> to vector<8x8x128xf32>
    %18 = arith.addf %15, %17 : vector<8x8x128xf32>
    %19 = math.tanh %18 : vector<8x8x128xf32>
    %cst_13 = arith.constant dense<0.000000e+00> : vector<8x8xf32>
    %20 = vector.multi_reduction <add>, %19, %cst_13 [2] : vector<8x8x128xf32> to vector<8x8xf32>
    %21 = vector.shape_cast %20 : vector<8x8xf32> to vector<8x8x1xf32>
    %cst_14 = arith.constant dense<0xFF800000> : vector<8x1xf32>
    %22 = vector.multi_reduction <maximumf>, %21, %cst_14 [0] : vector<8x8x1xf32> to vector<8x1xf32>
    %23 = vector.shape_cast %22 : vector<8x1xf32> to vector<1x8x1xf32>
    %24 = vector.broadcast %23 : vector<1x8x1xf32> to vector<8x8x1xf32>
    %25 = arith.subf %21, %24 : vector<8x8x1xf32>
    %26 = math.exp %25 : vector<8x8x1xf32>
    %cst_15 = arith.constant dense<0.000000e+00> : vector<8x1xf32>
    %27 = vector.multi_reduction <add>, %26, %cst_15 [0] : vector<8x8x1xf32> to vector<8x1xf32>
    %28 = vector.shape_cast %27 : vector<8x1xf32> to vector<1x8x1xf32>
    %29 = vector.broadcast %28 : vector<1x8x1xf32> to vector<8x8x1xf32>
    %30 = arith.divf %26, %29 : vector<8x8x1xf32>
    %31 = vector.shape_cast %6 : vector<64x32xf32> to vector<8x8x32xf32>
    %32 = vector.broadcast %30 : vector<8x8x1xf32> to vector<8x8x32xf32>
    %33 = arith.mulf %32, %31 : vector<8x8x32xf32>
    %cst_16 = arith.constant dense<0.000000e+00> : vector<8x32xf32>
    %34 = vector.multi_reduction <add>, %33, %cst_16 [0] : vector<8x8x32xf32> to vector<8x32xf32>
    %35 = arith.truncf %34 : vector<8x32xf32> to vector<8x32xbf16>
    %c0_17 = arith.constant 0 : index
    %c0_18 = arith.constant 0 : index
    %36 = vector.load %arg7[%c0_17, %c0_18] : memref<32x96xbf16, #tpu.memory_space<vmem>>, vector<32x96xbf16>
    %cst_19 = arith.constant dense<0.000000e+00> : vector<8x96xf32>
    %37 = tpu.matmul %7, %36, %cst_19 {dimension_numbers = #tpu.dot_dimension_numbers<[1], [0], [0], [1], [0, 0, 1, 1], [], []>} : vector<8x32xbf16>, vector<32x96xbf16>, vector<8x96xf32> -> vector<8x96xf32>
    %c0_20 = arith.constant 0 : index
    %c0_21 = arith.constant 0 : index
    %38 = vector.load %arg8[%c0_20, %c0_21] : memref<32x96xbf16, #tpu.memory_space<vmem>>, vector<32x96xbf16>
    %cst_22 = arith.constant dense<0.000000e+00> : vector<8x96xf32>
    %39 = tpu.matmul %35, %38, %cst_22 {dimension_numbers = #tpu.dot_dimension_numbers<[1], [0], [0], [1], [0, 0, 1, 1], [], []>} : vector<8x32xbf16>, vector<32x96xbf16>, vector<8x96xf32> -> vector<8x96xf32>
    %40 = arith.addf %37, %39 : vector<8x96xf32>
    %c0_23 = arith.constant 0 : index
    %c0_24 = arith.constant 0 : index
    %41 = vector.load %arg10[%c0_23, %c0_24] : memref<1x96xf32, #tpu.memory_space<vmem>>, vector<1x96xf32>
    %42 = vector.broadcast %41 : vector<1x96xf32> to vector<8x96xf32>
    %43 = arith.addf %40, %42 : vector<8x96xf32>
    %c0_25 = arith.constant 0 : index
    %c0_26 = arith.constant 0 : index
    %44 = vector.load %arg9[%c0_25, %c0_26] : memref<32x96xbf16, #tpu.memory_space<vmem>>, vector<32x96xbf16>
    %cst_27 = arith.constant dense<0.000000e+00> : vector<8x96xf32>
    %45 = tpu.matmul %8, %44, %cst_27 {dimension_numbers = #tpu.dot_dimension_numbers<[1], [0], [0], [1], [0, 0, 1, 1], [], []>} : vector<8x32xbf16>, vector<32x96xbf16>, vector<8x96xf32> -> vector<8x96xf32>
    %c0_28 = arith.constant 0 : index
    %c0_29 = arith.constant 0 : index
    %46 = vector.load %arg11[%c0_28, %c0_29] : memref<1x96xf32, #tpu.memory_space<vmem>>, vector<1x96xf32>
    %47 = vector.broadcast %46 : vector<1x96xf32> to vector<8x96xf32>
    %48 = arith.addf %45, %47 : vector<8x96xf32>
    %49 = vector.extract_strided_slice %43 {offsets = [0, 0], sizes = [8, 32], strides = [1, 1]} : vector<8x96xf32> to vector<8x32xf32>
    %50 = vector.extract_strided_slice %43 {offsets = [0, 32], sizes = [8, 32], strides = [1, 1]} : vector<8x96xf32> to vector<8x32xf32>
    %51 = vector.extract_strided_slice %43 {offsets = [0, 64], sizes = [8, 32], strides = [1, 1]} : vector<8x96xf32> to vector<8x32xf32>
    %52 = vector.extract_strided_slice %48 {offsets = [0, 0], sizes = [8, 32], strides = [1, 1]} : vector<8x96xf32> to vector<8x32xf32>
    %53 = vector.extract_strided_slice %48 {offsets = [0, 32], sizes = [8, 32], strides = [1, 1]} : vector<8x96xf32> to vector<8x32xf32>
    %54 = vector.extract_strided_slice %48 {offsets = [0, 64], sizes = [8, 32], strides = [1, 1]} : vector<8x96xf32> to vector<8x32xf32>
    %55 = arith.addf %49, %52 : vector<8x32xf32>
    %56 = arith.negf %55 : vector<8x32xf32>
    %57 = math.exp %56 : vector<8x32xf32>
    %cst_30 = arith.constant 1.000000e+00 : f32
    %58 = vector.broadcast %cst_30 : f32 to vector<8x32xf32>
    %59 = arith.addf %58, %57 : vector<8x32xf32>
    %60 = arith.divf %58, %59 : vector<8x32xf32>
    %61 = arith.addf %50, %53 : vector<8x32xf32>
    %62 = arith.negf %61 : vector<8x32xf32>
    %63 = math.exp %62 : vector<8x32xf32>
    %cst_31 = arith.constant 1.000000e+00 : f32
    %64 = vector.broadcast %cst_31 : f32 to vector<8x32xf32>
    %65 = arith.addf %64, %63 : vector<8x32xf32>
    %66 = arith.divf %64, %65 : vector<8x32xf32>
    %67 = arith.mulf %60, %54 : vector<8x32xf32>
    %68 = arith.addf %51, %67 : vector<8x32xf32>
    %69 = math.tanh %68 : vector<8x32xf32>
    %cst_32 = arith.constant 1.000000e+00 : f32
    %70 = vector.broadcast %cst_32 : f32 to vector<8x32xf32>
    %71 = arith.subf %70, %66 : vector<8x32xf32>
    %72 = arith.mulf %71, %69 : vector<8x32xf32>
    %73 = arith.mulf %66, %5 : vector<8x32xf32>
    %74 = arith.addf %72, %73 : vector<8x32xf32>
    %75 = arith.truncf %74 : vector<8x32xf32> to vector<8x32xbf16>
    %c0_33 = arith.constant 0 : index
    %c0_34 = arith.constant 0 : index
    %76 = vector.load %arg12[%c0_33, %c0_34] : memref<32x128xbf16, #tpu.memory_space<vmem>>, vector<32x128xbf16>
    %cst_35 = arith.constant dense<0.000000e+00> : vector<8x128xf32>
    %77 = tpu.matmul %75, %76, %cst_35 {dimension_numbers = #tpu.dot_dimension_numbers<[1], [0], [0], [1], [0, 0, 1, 1], [], []>} : vector<8x32xbf16>, vector<32x128xbf16>, vector<8x128xf32> -> vector<8x128xf32>
    %c0_36 = arith.constant 0 : index
    %c0_37 = arith.constant 0 : index
    %78 = vector.load %arg13[%c0_36, %c0_37] : memref<32x128xbf16, #tpu.memory_space<vmem>>, vector<32x128xbf16>
    %cst_38 = arith.constant dense<0.000000e+00> : vector<8x128xf32>
    %79 = tpu.matmul %35, %78, %cst_38 {dimension_numbers = #tpu.dot_dimension_numbers<[1], [0], [0], [1], [0, 0, 1, 1], [], []>} : vector<8x32xbf16>, vector<32x128xbf16>, vector<8x128xf32> -> vector<8x128xf32>
    %80 = arith.addf %77, %79 : vector<8x128xf32>
    %c0_39 = arith.constant 0 : index
    %c0_40 = arith.constant 0 : index
    %81 = vector.load %arg14[%c0_39, %c0_40] : memref<32x128xbf16, #tpu.memory_space<vmem>>, vector<32x128xbf16>
    %cst_41 = arith.constant dense<0.000000e+00> : vector<8x128xf32>
    %82 = tpu.matmul %7, %81, %cst_41 {dimension_numbers = #tpu.dot_dimension_numbers<[1], [0], [0], [1], [0, 0, 1, 1], [], []>} : vector<8x32xbf16>, vector<32x128xbf16>, vector<8x128xf32> -> vector<8x128xf32>
    %83 = arith.addf %80, %82 : vector<8x128xf32>
    %c0_42 = arith.constant 0 : index
    %c0_43 = arith.constant 0 : index
    %84 = vector.load %arg15[%c0_42, %c0_43] : memref<1x128xf32, #tpu.memory_space<vmem>>, vector<1x128xf32>
    %85 = vector.broadcast %84 : vector<1x128xf32> to vector<8x128xf32>
    %86 = arith.addf %83, %85 : vector<8x128xf32>
    %c0_44 = arith.constant 0 : index
    %c0_45 = arith.constant 0 : index
    %c0_46 = arith.constant 0 : index
    %87 = vector.load %arg16[%c0_44, %c0_45, %c0_46] : memref<1x8x128xf32, #tpu.memory_space<vmem>>, vector<1x8x128xf32>
    %88 = vector.shape_cast %87 : vector<1x8x128xf32> to vector<8x128xf32>
    %89 = vector.shape_cast %86 : vector<8x128xf32> to vector<1x8x128xf32>
    tpu.vector_store %arg16[%c0_44, %c0_45, %c0_46], %89 {strides = array<i32>} : memref<1x8x128xf32, #tpu.memory_space<vmem>>, vector<1x8x128xf32>,
    %c0_47 = arith.constant 0 : index
    %c0_48 = arith.constant 0 : index
    %90 = vector.load %arg19[%c0_47, %c0_48] : memref<8x32xf32, #tpu.memory_space<vmem>>, vector<8x32xf32>
    tpu.vector_store %arg19[%c0_47, %c0_48], %74 {strides = array<i32>} : memref<8x32xf32, #tpu.memory_space<vmem>>, vector<8x32xf32>,
    %c0_49 = arith.constant 0 : index
    %c0_50 = arith.constant 0 : index
    %91 = vector.load %arg17[%c0_49, %c0_50] : memref<8x32xf32, #tpu.memory_space<vmem>>, vector<8x32xf32>
    tpu.vector_store %arg17[%c0_49, %c0_50], %74 {strides = array<i32>} : memref<8x32xf32, #tpu.memory_space<vmem>>, vector<8x32xf32>,
    return
  }
  func.func @transform_0(%arg0: i32) -> (i32, i32, i32) {
    %c0_i32 = arith.constant 0 : i32
    %c0_i32_0 = arith.constant 0 : i32
    %c0_i32_1 = arith.constant 0 : i32
    return %arg0, %c0_i32, %c0_i32_0 : i32, i32, i32
  }
  func.func @transform_1(%arg0: i32) -> (i32, i32) {
    %c0_i32 = arith.constant 0 : i32
    %c0_i32_0 = arith.constant 0 : i32
    %c0_i32_1 = arith.constant 0 : i32
    return %c0_i32, %c0_i32_0 : i32, i32
  }
  func.func @transform_2(%arg0: i32) -> (i32, i32) {
    %c0_i32 = arith.constant 0 : i32
    %c0_i32_0 = arith.constant 0 : i32
    %c0_i32_1 = arith.constant 0 : i32
    return %c0_i32, %c0_i32_0 : i32, i32
  }
  func.func @transform_3(%arg0: i32) -> (i32, i32) {
    %c0_i32 = arith.constant 0 : i32
    %c0_i32_0 = arith.constant 0 : i32
    %c0_i32_1 = arith.constant 0 : i32
    return %c0_i32, %c0_i32_0 : i32, i32
  }
  func.func @transform_4(%arg0: i32) -> (i32, i32) {
    %c0_i32 = arith.constant 0 : i32
    %c0_i32_0 = arith.constant 0 : i32
    %c0_i32_1 = arith.constant 0 : i32
    return %c0_i32, %c0_i32_0 : i32, i32
  }
  func.func @transform_5(%arg0: i32) -> (i32, i32) {
    %c0_i32 = arith.constant 0 : i32
    %c0_i32_0 = arith.constant 0 : i32
    %c0_i32_1 = arith.constant 0 : i32
    return %c0_i32, %c0_i32_0 : i32, i32
  }
  func.func @transform_6(%arg0: i32) -> (i32, i32) {
    %c0_i32 = arith.constant 0 : i32
    %c0_i32_0 = arith.constant 0 : i32
    %c0_i32_1 = arith.constant 0 : i32
    return %c0_i32, %c0_i32_0 : i32, i32
  }
  func.func @transform_7(%arg0: i32) -> (i32, i32) {
    %c0_i32 = arith.constant 0 : i32
    %c0_i32_0 = arith.constant 0 : i32
    %c0_i32_1 = arith.constant 0 : i32
    return %c0_i32, %c0_i32_0 : i32, i32
  }
  func.func @transform_8(%arg0: i32) -> (i32, i32) {
    %c0_i32 = arith.constant 0 : i32
    %c0_i32_0 = arith.constant 0 : i32
    %c0_i32_1 = arith.constant 0 : i32
    return %c0_i32, %c0_i32_0 : i32, i32
  }
  func.func @transform_9(%arg0: i32) -> (i32, i32) {
    %c0_i32 = arith.constant 0 : i32
    %c0_i32_0 = arith.constant 0 : i32
    %c0_i32_1 = arith.constant 0 : i32
    return %c0_i32, %c0_i32_0 : i32, i32
  }
  func.func @transform_10(%arg0: i32) -> (i32, i32) {
    %c0_i32 = arith.constant 0 : i32
    %c0_i32_0 = arith.constant 0 : i32
    %c0_i32_1 = arith.constant 0 : i32
    return %c0_i32, %c0_i32_0 : i32, i32
  }
  func.func @transform_11(%arg0: i32) -> (i32, i32) {
    %c0_i32 = arith.constant 0 : i32
    %c0_i32_0 = arith.constant 0 : i32
    %c0_i32_1 = arith.constant 0 : i32
    return %c0_i32, %c0_i32_0 : i32, i32
  }
  func.func @transform_12(%arg0: i32) -> (i32, i32) {
    %c0_i32 = arith.constant 0 : i32
    %c0_i32_0 = arith.constant 0 : i32
    %c0_i32_1 = arith.constant 0 : i32
    return %c0_i32, %c0_i32_0 : i32, i32
  }
  func.func @transform_13(%arg0: i32) -> (i32, i32) {
    %c0_i32 = arith.constant 0 : i32
    %c0_i32_0 = arith.constant 0 : i32
    %c0_i32_1 = arith.constant 0 : i32
    return %c0_i32, %c0_i32_0 : i32, i32
  }
  func.func @transform_14(%arg0: i32) -> (i32, i32) {
    %c0_i32 = arith.constant 0 : i32
    %c0_i32_0 = arith.constant 0 : i32
    %c0_i32_1 = arith.constant 0 : i32
    return %c0_i32, %c0_i32_0 : i32, i32
  }
  func.func @transform_15(%arg0: i32) -> (i32, i32, i32) {
    %c0_i32 = arith.constant 0 : i32
    %c0_i32_0 = arith.constant 0 : i32
    %c0_i32_1 = arith.constant 0 : i32
    return %arg0, %c0_i32, %c0_i32_0 : i32, i32, i32
  }
  func.func @transform_16(%arg0: i32) -> (i32, i32) {
    %c0_i32 = arith.constant 0 : i32
    %c0_i32_0 = arith.constant 0 : i32
    %c0_i32_1 = arith.constant 0 : i32
    return %c0_i32, %c0_i32_0 : i32, i32
  }
}

</mosaic_0001>

<bundles_post_ra>
// kernel: decoder_decode_fused.1
= control target key start
LH: loop header
LB: loop body
LE: loop exit
PB: predicated region body
PF: predicated region fallthrough
CT: control target
= control target key end

     0   :  { %v969_v1 = vmov 0.0   ;;  %vm970_vm0 = vmmov 0   ;;  %vm58_vm1 = vcmask 261120   ;;  %s971_s29 = smov 64   ;;  %s972_s17 = smov 96   ;;  %s1253_s4 = inlined_call_operand.vmem [shape: bf16[32,128], index: 4, kind: input, shape index: {}]   ;;  %s1254_s3 = inlined_call_operand.vmem [shape: bf16[32,128], index: 3, kind: input, shape index: {}]   ;;  %s1255_s2 = inlined_call_operand.vmem [shape: f32[64,32], index: 2, kind: input, shape index: {}]   ;;  %s1256_s1 = inlined_call_operand.vmem [shape: f32[8,32], index: 1, kind: input, shape index: {}, may-alias: {1,16}]   ;;  %s1257_s5 = inlined_call_operand.vmem [shape: f32[1,128], index: 5, kind: input, shape index: {}]   ;;  %s1258_s6 = inlined_call_operand.vmem [shape: bf16[32,96], index: 6, kind: input, shape index: {}]   ;;  %s1259_s7 = inlined_call_operand.vmem [shape: bf16[32,96], index: 7, kind: input, shape index: {}]   ;;  %s1260_s0 = inlined_call_operand.vmem [shape: f32[1,8,32], index: 0, kind: input, shape index: {}]   ;;  %s1261_s12 = inlined_call_operand.vmem [shape: bf16[32,128], index: 12, kind: input, shape index: {}]   ;;  %s1262_s8 = inlined_call_operand.vmem [shape: bf16[32,96], index: 8, kind: input, shape index: {}]   ;;  %s1263_s10 = inlined_call_operand.vmem [shape: f32[1,96], index: 10, kind: input, shape index: {}]   ;;  %s1264_s9 = inlined_call_operand.vmem [shape: f32[1,96], index: 9, kind: input, shape index: {}]   ;;  %s1265_s11 = inlined_call_operand.vmem [shape: bf16[32,128], index: 11, kind: input, shape index: {}]   ;;  %s1266_s13 = inlined_call_operand.vmem [shape: bf16[32,128], index: 13, kind: input, shape index: {}]   ;;  %s1267_s16 = inlined_call_operand.vmem [shape: f32[8,32], index: 16, kind: output, shape index: {1}, may-alias: {1,16}]   ;;  %s1268_s14 = inlined_call_operand.vmem [shape: f32[1,128], index: 14, kind: input, shape index: {}]   ;;  %s1269_s15 = inlined_call_operand.vmem [shape: f32[1,8,128], index: 15, kind: output, shape index: {0}]  }
   0x1   :  { %1271 = sst [smem:[#allocation4_spill]] %s1253_s4  ;;  %852 = vmatprep.subr.bf16.mxu1 %v969_v1  ;;  %856 = vmatprep.mubr.msk.bf16.mxu1 %vm970_vm0, %v969_v1  ;;  %v914_v2 = vld [vmem:[%s1254_s3] sm:$0xff]   ;;  %v916_v4 = vld [vmem:[%s1254_s3 + $0x8] sm:$0xff]   ;;  %v1088_v7 = vld [vmem:[%s1255_s2 + $0x10] sm:$0xff]  ;;  %s973_s21 = smov 32  }
   0x2   :  { %s1272_s23 = sld [smem:[#allocation4_spill]]  ;;  %853 = vmatpush3.bf16.msra.mxu1 %v914_v2  ;;  %v1078_v5 = vld [vmem:[%s1255_s2] sm:$0xff]  ;;  %v1083_v6 = vld [vmem:[%s1255_s2 + $0x8] sm:$0xff]  ;;  %v1095_v9 = vld [vmem:[%s1255_s2 + $0x18] sm:$0xff] }
   0x3   :  { %854 = vmatprep.subr.bf16.mxu1 %v969_v1  ;;  %v68_v8 = vpack.c.bf16 %v1083_v6, %v1078_v5  ;;  %v57_v10 = vld [vmem:[%s1256_s1] sm:$0xff]  ;;  %v69_v12 = vpack.c.bf16 %v1095_v9, %v1088_v7  ;;  %v1111_v13 = vld [vmem:[%s1255_s2 + $0x28] sm:$0xff]  ;;  %v1123_v15 = vld [vmem:[%s1255_s2 + $0x30] sm:$0xff] }
   0x4   :  { %v1103_v11 = vld [vmem:[%s1255_s2 + $0x20] sm:$0xff]  ;;  %59 = vst.msk [vmem:[#allocation3] sm:$0xff] %vm58_vm1, %v57_v10  ;;  %v1128_v16 = vld [vmem:[%s1255_s2 + $0x38] sm:$0xff]  ;;  %v918_v51 = vld [vmem:[%s1258_s6 + $0x8] sm:$0xff]  }
   0x5   :  { %v70_v14 = vpack.c.bf16 %v1111_v13, %v1103_v11  ;;  %844 = vmatprep.mubr.msk.bf16.mxu0 %vm58_vm1, %v68_v8  ;;  %v71_v19 = vpack.c.bf16 %v1128_v16, %v1123_v15  ;;  %v787_v24 = vld [vmem:[%s1257_s5] ss:$0 sm:$0xff]  ;;  %v921_v55 = vld [vmem:[%s1259_s7 + $0x8] sm:$0xff]  }
   0x6   :  { %855 = vmatpush3.bf16.msra.mxu1 %v916_v4  ;;  %v917_v50 = vld [vmem:[%s1258_s6] sm:$0xff]   ;;  %v922_v57 = vld [vmem:[%s1261_s12 + $0x8] sm:$0xff]  }
   0x7   :  { %860 = vmatprep.subr.bf16.mxu1 %v969_v1  ;;  %v919_v52 = vld [vmem:[%s1259_s7] sm:$0xff]  }
   0x8   :  { %v913_v0 = vld [vmem:[%s1272_s23] sm:$0xff]   ;;  %v915_v3 = vld [vmem:[%s1272_s23 + $0x8] sm:$0xff]  }
   0x9   :  { %840 = vmatprep.subr.bf16.mxu0 %v913_v0  ;;  %v173_v53 = vld [vmem:[%s1260_s0] sm:$0xff] }
   0xa   :  { %841 = vmatpush3.bf16.msra.mxu0 %v913_v0  ;;  %v1161_v54 = vpack.c.bf16 %v173_v53, %v173_v53  ;;  %v920_v56 = vld [vmem:[%s1261_s12] sm:$0xff]  }
   0xb   :  { %842 = vmatprep.subr.bf16.mxu0 %v915_v3  ;;  %v1130_v17 = vld [vmem:[#allocation3] sm:$0xff] }
   0xc   :  { %v1134_v18 = vpack.c.bf16 %v1130_v17, %v1130_v17 }
   0xe   :  { %843 = vmatpush3.bf16.msra.mxu0 %v915_v3  ;;  %857 = vmatmul.mubr.msk.bf16.vlgmr.msra.gmra.mrb[0].mxu1 %vm58_vm1, %v1134_v18 }
   0xf   :  { %868 = vmatprep.subr.bf16.mxu0 %v969_v1  ;;  %864 = vmatprep.mubr.msk.bf16.mxu1 %vm970_vm0, %v969_v1 }
  0x10   :  { %861 = vmatpush3.bf16.msra.mxu1 %v919_v52 }
  0x11   :  { %845 = vmatmul.mubr.msk.bf16.vlgmr.msra.gmra.mrb[0].mxu0 %vm58_vm1, %v69_v12  ;;  %862 = vmatprep.subr.bf16.mxu1 %v969_v1 }
  0x12   :  { %848 = vmatprep.mubr.msk.bf16.mxu0 %vm58_vm1, %v70_v14  ;;  %869 = vmatpush3.bf16.msra.mxu0 %v917_v50 }
  0x13   :  { %870 = vmatprep.subr.bf16.mxu0 %v969_v1 }
  0x14   :  { %863 = vmatpush3.bf16.msra.mxu1 %v921_v55 }
  0x15   :  { %876 = vmatprep.subr.bf16.mxu1 %v969_v1 }
  0x16   :  { %871 = vmatpush3.bf16.msra.mxu0 %v918_v51 }
  0x17   :  { %884 = vmatprep.subr.bf16.mxu0 %v969_v1 }
  0x19   :  { %849 = vmatmul.mubr.msk.bf16.gmra.mrb[4].mxu0 %vm58_vm1, %v71_v19 }
  0x1a   :  { %872 = vmatprep.mubr.msk.bf16.mxu0 %vm970_vm0, %v969_v1 }
  0x21   :  { %873 = vmatmul.mubr.msk.bf16.vlgmr.msra.gmra.mrb[8].mxu0 %vm58_vm1, %v1161_v54 }
  0x22   :  { %885 = vmatpush3.bf16.msra.mxu0 %v920_v56  ;;  %888 = vmatprep.mubr.msk.bf16.mxu0 %vm970_vm0, %v969_v1 }
  0x23   :  { %886 = vmatprep.subr.bf16.mxu0 %v969_v1 }
  0x26   :  { %887 = vmatpush3.bf16.msra.mxu0 %v922_v57 }
  0x27   :  { %900 = vmatprep.subr.bf16.mxu0 %v969_v1 }
  0xe1   :  { %v246_v25 = vpop.f32.mrb[0].mxu1 }
  0xe2   :  { %v247_v26 = vadd.f32 %v787_v24, %v246_v25  ;;  %v858_v27 = vpop.f32.mrb[1].mxu1 }
  0xe3   :  { %v249_v28 = vpop.f32.mrb[2].mxu1 }
  0xe4   :  { %v846_v20 = vpop.f32.mrb[0].mxu0  ;;  %v859_v33 = vpop.f32.mrb[3].mxu1 }
  0xe5   :  { %v134_v21 = vpop.f32.mrb[1].mxu0  ;;  %v262_v38 = vadd.f32 %v846_v20, %v247_v26 }
  0xe6   :  { %v847_v22 = vpop.f32.mrb[2].mxu0  ;;  %v260_v30 = vadd.f32 %v247_v26, %v134_v21 }
  0xe7   :  { %v137_v23 = vpop.f32.mrb[3].mxu0  ;;  %v263_v31 = vadd.f32 %v847_v22, %v247_v26 }
  0xe8   :  { %v261_v32 = vadd.f32 %v247_v26, %v137_v23  ;;  %929 = vtanh.f32 %v260_v30 }
  0xea   :  { %931 = vtanh.f32 %v261_v32 }
  0xeb   :  { %933 = vtanh.f32 %v262_v38 }
  0xec   :  { %v850_v29 = vpop.f32.mrb[4].mxu0 }
  0xed   :  { %v266_v34 = vadd.f32 %v850_v29, %v247_v26  ;;  %v150_v35 = vpop.f32.mrb[5].mxu0 }
  0xee   :  { %v264_v36 = vadd.f32 %v247_v26, %v150_v35  ;;  %v851_v37 = vpop.f32.mrb[6].mxu0 }
  0xef   :  { %v267_v39 = vadd.f32 %v851_v37, %v247_v26  ;;  %v153_v40 = vpop.f32.mrb[7].mxu0 }
  0xf0   :  { %v265_v41 = vadd.f32 %v247_v26, %v153_v40  ;;  %935 = vtanh.f32 %v264_v36 }
  0xf1   :  { %937 = vtanh.f32 %v263_v31 }
  0xf2   :  { %v930_v42 = vpop.eup %929  ;;  %939 = vtanh.f32 %v266_v34 }
  0xf3   :  { %276 = vadd.xlane.f32.xlu0 %v930_v42  ;;  %941 = vtanh.f32 %v265_v41 }
  0xf4   :  { %v932_v43 = vpop.eup %931  ;;  %943 = vtanh.f32 %v267_v39 }
  0xf5   :  { %v934_v44 = vpop.eup %933 }
  0xf6   :  { %280 = vadd.xlane.f32.xlu1 %v934_v44 }
  0xf7   :  { %278 = vadd.xlane.f32.xlu0 %v932_v43 }
  0xfa   :  { %v936_v45 = vpop.eup %935 }
  0xfb   :  { %284 = vadd.xlane.f32.xlu0 %v936_v45  ;;  %v938_v46 = vpop.eup %937 }
  0xfc   :  { %v940_v47 = vpop.eup %939  ;;  %282 = vadd.xlane.f32.xlu1 %v938_v46 }
  0xfd   :  { %v942_v48 = vpop.eup %941 }
  0xfe   :  { %v944_v49 = vpop.eup %943 }
  0xff   :  { %288 = vadd.xlane.f32.xlu0 %v940_v47 }
 0x100   :  { %286 = vadd.xlane.f32.xlu1 %v942_v48 }
 0x104   :  { %290 = vadd.xlane.f32.xlu1 %v944_v49 }
 0x180   :  { %v277_v58 = vpop.xlane.xlu0 %276 }
 0x183   :  { %v281_v60 = vpop.xlane.xlu1 %280 }
 0x184   :  { %v279_v59 = vpop.xlane.xlu0 %278 }
 0x188   :  { %v285_v61 = vpop.xlane.xlu0 %284 }
 0x189   :  { %v283_v62 = vpop.xlane.xlu1 %282  ;;  %v292_v2 = vmax.f32 %v277_v58, %v285_v61 }
 0x18c   :  { %v289_v0 = vpop.xlane.xlu0 %288 }
 0x18d   :  { %v287_v63 = vpop.xlane.xlu1 %286  ;;  %v294_v4 = vmax.f32 %v281_v60, %v289_v0 }
 0x18e   :  { %v293_v3 = vmax.f32 %v279_v59, %v287_v63 }
 0x190   :  { %v296_v12 = vmax.f32 %v292_v2, %v293_v3 }
 0x191   :  { %v291_v8 = vpop.xlane.xlu1 %290 }
 0x192   :  { %v295_v10 = vmax.f32 %v283_v62, %v291_v8 }
 0x194   :  { %v297_v14 = vmax.f32 %v294_v4, %v295_v10 }
 0x196   :  { %v298_v19 = vmax.f32 %v296_v12, %v297_v14 }
 0x198   :  { %v299_v20 = vsub.f32 %v277_v58, %v298_v19  ;;  %v300_v21 = vsub.f32 %v279_v59, %v298_v19  ;;  %v301_v22 = vsub.f32 %v281_v60, %v298_v19  ;;  %v302_v23 = vsub.f32 %v283_v62, %v298_v19 }
 0x199   :  { %v303_v26 = vsub.f32 %v285_v61, %v298_v19  ;;  %v304_v28 = vsub.f32 %v287_v63, %v298_v19  ;;  %v305_v30 = vsub.f32 %v289_v0, %v298_v19  ;;  %v306_v32 = vsub.f32 %v291_v8, %v298_v19 }
 0x19a   :  { %v307_v24 = vmul.f32 1.442695, %v299_v20  ;;  %v309_v25 = vmul.f32 1.442695, %v300_v21  ;;  %v311_v27 = vmul.f32 1.442695, %v301_v22 }
 0x19b   :  { %v313_v29 = vmul.f32 1.442695, %v302_v23  ;;  %v315_v31 = vmul.f32 1.442695, %v303_v26  ;;  %v317_v33 = vmul.f32 1.442695, %v304_v28 }
 0x19c   :  { %945 = vpow2.f32 %v307_v24  ;;  %v319_v34 = vmul.f32 1.442695, %v305_v30  ;;  %v321_v35 = vmul.f32 1.442695, %v306_v32 }
 0x19d   :  { %947 = vpow2.f32 %v309_v25 }
 0x19e   :  { %949 = vpow2.f32 %v311_v27 }
 0x19f   :  { %951 = vpow2.f32 %v313_v29 }
 0x1a0   :  { %953 = vpow2.f32 %v315_v31 }
 0x1a1   :  { %955 = vpow2.f32 %v317_v33 }
 0x1a2   :  { %957 = vpow2.f32 %v319_v34 }
 0x1a3   :  { %959 = vpow2.f32 %v321_v35 }
 0x1a6   :  { %v946_v36 = vpop.eup %945 }
 0x1a7   :  { %v948_v37 = vpop.eup %947 }
 0x1a8   :  { %v323_v38 = vadd.f32 %v948_v37, %v946_v36  ;;  %v950_v39 = vpop.eup %949 }
 0x1a9   :  { %v952_v41 = vpop.eup %951 }
 0x1aa   :  { %v324_v40 = vadd.f32 %v950_v39, %v323_v38  ;;  %v954_v43 = vpop.eup %953 }
 0x1ab   :  { %v956_v45 = vpop.eup %955 }
 0x1ac   :  { %v325_v42 = vadd.f32 %v952_v41, %v324_v40  ;;  %v958_v47 = vpop.eup %957 }
 0x1ad   :  { %v960_v49 = vpop.eup %959 }
 0x1ae   :  { %v326_v44 = vadd.f32 %v954_v43, %v325_v42 }
 0x1b0   :  { %v327_v46 = vadd.f32 %v956_v45, %v326_v44  ;;  %v797_v44 = vld [vmem:[%s1264_s9] ss:$0 sm:$0xff] }
 0x1b2   :  { %v328_v48 = vadd.f32 %v958_v47, %v327_v46 }
 0x1b4   :  { %v329_v50 = vadd.f32 %v960_v49, %v328_v48 }
 0x1b6   :  { %961 = vrcp.f32 %v329_v50 }
 0x1c0   :  { %v962_v51 = vpop.eup %961 }
 0x1c1   :  { %v331_v52 = vmul.f32 %v962_v51, %v946_v36  ;;  %v332_v53 = vmul.f32 %v962_v51, %v948_v37  ;;  %v333_v55 = vmul.f32 %v962_v51, %v950_v39  ;;  %v334_v56 = vmul.f32 %v962_v51, %v952_v41 }
 0x1c2   :  { %v335_v57 = vmul.f32 %v962_v51, %v954_v43  ;;  %v336_v61 = vmul.f32 %v962_v51, %v956_v45  ;;  %v337_v3 = vmul.f32 %v962_v51, %v958_v47  ;;  %v338_v12 = vmul.f32 %v962_v51, %v960_v49 }
 0x1c3   :  { %v339_v58 = vmul.f32 %v331_v52, %v1078_v5  ;;  %v340_v59 = vmul.f32 %v332_v53, %v1083_v6  ;;  %v341_v60 = vmul.f32 %v333_v55, %v1088_v7  ;;  %v342_v62 = vmul.f32 %v334_v56, %v1095_v9  ;;  %v925_v56 = vld [vmem:[%s1265_s11] sm:$0xff]  }
 0x1c4   :  { %v343_v4 = vmul.f32 %v335_v57, %v1103_v11  ;;  %v344_v5 = vmul.f32 %v336_v61, %v1111_v13  ;;  %v345_v14 = vmul.f32 %v337_v3, %v1123_v15  ;;  %v346_v20 = vmul.f32 %v338_v12, %v1128_v16  ;;  %v923_v13 = vld [vmem:[%s1262_s8] sm:$0xff]   ;;  %v924_v15 = vld [vmem:[%s1262_s8 + $0x8] sm:$0xff]   ;;  %v475_v16 = vpop.f32.mrb[8].mxu0 }
 0x1c5   :  { %v347_v63 = vsel %vm58_vm1, %v339_v58, 0.0  ;;  %v348_v0 = vsel %vm58_vm1, %v340_v59, 0.0  ;;  %v350_v8 = vsel %vm58_vm1, %v341_v60, 0.0  ;;  %v352_v6 = vsel %vm58_vm1, %v342_v62, 0.0  ;;  %v874_v27 = vpop.f32.mrb[9].mxu0  ;;  %v926_v58 = vld [vmem:[%s1266_s13] sm:$0xff]  }
 0x1c6   :  { %v349_v2 = vadd.f32 %v348_v0, %v347_v63  ;;  %v354_v9 = vsel %vm58_vm1, %v343_v4, 0.0  ;;  %v356_v21 = vsel %vm58_vm1, %v344_v5, 0.0  ;;  %v358_v11 = vsel %vm58_vm1, %v345_v14, 0.0  ;;  %v478_v28 = vpop.f32.mrb[10].mxu0  ;;  %v927_v59 = vld [vmem:[%s1265_s11 + $0x8] sm:$0xff]  }
 0x1c7   :  { %v360_v24 = vsel %vm58_vm1, %v346_v20, 0.0  ;;  %v875_v29 = vpop.f32.mrb[11].mxu0  ;;  %v928_v60 = vld [vmem:[%s1266_s13 + $0x8] sm:$0xff]   ;;  %v812_v14 = vld [vmem:[%s1268_s14] ss:$0 sm:$0xff] }
 0x1c8   :  { %v351_v10 = vadd.f32 %v350_v8, %v349_v2 }
 0x1ca   :  { %v353_v7 = vadd.f32 %v352_v6, %v351_v10 }
 0x1cc   :  { %v355_v19 = vadd.f32 %v354_v9, %v353_v7 }
 0x1ce   :  { %v357_v22 = vadd.f32 %v356_v21, %v355_v19 }
 0x1d0   :  { %v359_v23 = vadd.f32 %v358_v11, %v357_v22 }
 0x1d2   :  { %v361_v25 = vadd.f32 %v360_v24, %v359_v23 }
 0x1d4   :  { %v362_v26 = vpack.c.bf16 %v361_v25, %v361_v25 }
 0x1d6   :  { %865 = vmatmul.mubr.msk.bf16.vlgmr.msra.gmra.mrb[4].mxu1 %vm58_vm1, %v362_v26  ;;  %889 = vmatmul.mubr.msk.bf16.vlgmr.msra.gmra.mrb[12].mxu0 %vm58_vm1, %v362_v26 }
 0x1d7   :  { %877 = vmatpush3.bf16.msra.mxu1 %v923_v13  ;;  %880 = vmatprep.mubr.msk.bf16.mxu1 %vm970_vm0, %v969_v1 }
 0x1d8   :  { %878 = vmatprep.subr.bf16.mxu1 %v969_v1  ;;  %904 = vmatprep.mubr.msk.bf16.mxu0 %vm970_vm0, %v969_v1 }
 0x1d9   :  { %901 = vmatpush3.bf16.msra.mxu0 %v926_v58 }
 0x1da   :  { %902 = vmatprep.subr.bf16.mxu0 %v969_v1 }
 0x1db   :  { %879 = vmatpush3.bf16.msra.mxu1 %v924_v15 }
 0x1dc   :  { %892 = vmatprep.subr.bf16.mxu1 %v969_v1 }
 0x1dd   :  { %903 = vmatpush3.bf16.msra.mxu0 %v928_v60 }
 0x1de   :  { %881 = vmatmul.mubr.msk.bf16.vlgmr.msra.gmra.mrb[8].mxu1 %vm58_vm1, %v1134_v18  ;;  %v798_v18 = vld [vmem:[%s1263_s10] ss:$0 sm:$0xff] }
 0x1df   :  { %896 = vmatprep.mubr.msk.bf16.mxu1 %vm970_vm0, %v969_v1  ;;  %893 = vmatpush3.bf16.msra.mxu1 %v925_v56 }
 0x1e0   :  { %894 = vmatprep.subr.bf16.mxu1 %v969_v1  ;;  %905 = vmatmul.mubr.msk.bf16.vlgmr.msra.gmra.mrb[16].mxu0 %vm58_vm1, %v1161_v54 }
 0x1e3   :  { %895 = vmatpush3.bf16.msra.mxu1 %v927_v59 }
 0x2a9   :  { %v420_v30 = vpop.f32.mrb[4].mxu1  ;;  %v1215_v31 = vpop.f32.mrb[12].mxu0 }
 0x2aa   :  { %v476_v32 = vadd.f32 %v475_v16, %v420_v30  ;;  %v866_v33 = vpop.f32.mrb[5].mxu1  ;;  %v890_v34 = vpop.f32.mrb[13].mxu0 }
 0x2ab   :  { %v423_v35 = vpop.f32.mrb[6].mxu1  ;;  %v640_v36 = vpop.f32.mrb[14].mxu0 }
 0x2ac   :  { %v867_v37 = vpop.f32.mrb[7].mxu1  ;;  %v891_v38 = vpop.f32.mrb[15].mxu0  ;;  %v488_v45 = vadd.f32 %v797_v44, %v476_v32 }
 0x2b1   :  { %v546_v39 = vpop.f32.mrb[8].mxu1 }
 0x2b2   :  { %v547_v40 = vadd.f32 %v798_v18, %v546_v39  ;;  %v882_v41 = vpop.f32.mrb[9].mxu1 }
 0x2b3   :  { %v549_v42 = vpop.f32.mrb[10].mxu1  ;;  %v751_v8 = vpop.f32.mrb[16].mxu0 }
 0x2b4   :  { %560 = vrot.lane.b32.xlu0 %v547_v40, %s971_s29  ;;  %v883_v43 = vpop.f32.mrb[11].mxu1  ;;  %v552_v46 = vadd.f32 %v547_v40, %v488_v45  ;;  %v906_v10 = vpop.f32.mrb[17].mxu0 }
 0x2b5   :  { %v754_v1 = vpop.f32.mrb[18].mxu0 }
 0x2b6   :  { %v802_v47 = vmul.f32 -1.442695, %v552_v46  ;;  %v907_v12 = vpop.f32.mrb[19].mxu0 }
 0x2b8   :  { %963 = vpow2.f32 %v802_v47 }
 0x2c2   :  { %v964_v48 = vpop.eup %963 }
 0x2c3   :  { %v556_v49 = vadd.f32 1.0, %v964_v48 }
 0x2c5   :  { %965 = vrcp.f32 %v556_v49 }
 0x2cf   :  { %v966_v50 = vpop.eup %965 }
 0x2d0   :  { %v570_v62 = vsub.f32 1.0, %v966_v50 }
 0x326   :  { %v561_v51 = vpop.permute.xlu0 %560 }
 0x327   :  { %v563_v52 = vmul.f32 %v966_v50, %v561_v51 }
 0x329   :  { %565 = vrot.lane.b32.xlu1 %v563_v52, %s971_s29 }
 0x39b   :  { %v566_v53 = vpop.permute.xlu1 %565 }
 0x39c   :  { %v568_v55 = vadd.f32 %v566_v53, %v488_v45 }
 0x39e   :  { %967 = vtanh.f32 %v568_v55 }
 0x3a8   :  { %v968_v57 = vpop.eup %967 }
 0x3a9   :  { %572 = vrot.lane.b32.xlu1 %v968_v57, %s972_s17 }
 0x3ad   :  { %577 = vrot.lane.b32.xlu1 %v1130_v17, %s973_s21 }
 0x41b   :  { %v573_v61 = vpop.permute.xlu1 %572 }
 0x41c   :  { %v575_v0 = vmul.f32 %v573_v61, %v570_v62 }
 0x41f   :  { %v578_v63 = vpop.permute.xlu1 %577 }
 0x420   :  { %v580_v2 = vmul.f32 %v966_v50, %v578_v63 }
 0x422   :  { %v581_v3 = vadd.f32 %v580_v2, %v575_v0 }
 0x424   :  { %768 = vrot.lane.b32.xlu1 %v581_v3, %s972_s17  ;;  %v582_v4 = vpack.c.bf16 %v581_v3, %v581_v3 }
 0x426   :  { %644 = vrot.lane.b32.xlu0 %v582_v4, %s972_s17 }
 0x496   :  { %v769_v5 = vpop.permute.xlu1 %768 }
 0x497   :  { %771 = vst.msk [vmem:[#allocation3] sm:$0xff] %vm58_vm1, %v769_v5  ;;  %772 = vst.msk [vmem:[%s1267_s16] sm:$0xff] %vm58_vm1, %v769_v5 }
 0x498   :  { %v645_v17 = vpop.permute.xlu0 %644 }
 0x499   :  { %897 = vmatmul.mubr.msk.bf16.vlgmr.msra.gmra.mrb[12].mxu1 %vm58_vm1, %v645_v17 }
 0x56c   :  { %v695_v54 = vpop.f32.mrb[12].mxu1 }
 0x56d   :  { %v696_v6 = vadd.f32 %v695_v54, %v1215_v31  ;;  %v898_v7 = vpop.f32.mrb[13].mxu1 }
 0x56e   :  { %v698_v9 = vpop.f32.mrb[14].mxu1 }
 0x56f   :  { %v757_v19 = vadd.f32 %v751_v8, %v696_v6  ;;  %v899_v20 = vpop.f32.mrb[15].mxu1 }
 0x571   :  { %v765_v21 = vadd.f32 %v812_v14, %v757_v19 }
 0x573   :  { %766 = vst [vmem:[%s1269_s15] sm:$0xff] %v765_v21 }

</bundles_post_ra>
